<compile_context>
chip_gen: v6e
topology: v6e:2x2x1
jax: 0.10.0
libtpu: 0.0.40
codegen_flags: <defaults>
</compile_context>

<pallas_src>
import functools
import math

import jax
import jax.numpy as jnp
from jax.experimental import pallas as pl
from jax.experimental.pallas import tpu as pltpu


_VMEM_SPEC = pl.BlockSpec(memory_space=pltpu.MemorySpace.VMEM)
_VMEM_BUDGET_BYTES = 24 * 1024 * 1024  # conservative vs v7x 64 MiB physical VMEM


def _round_up(n: int, m: int) -> int:
    return -(-n // m) * m


def _padded_vmem_bytes(shape, dtype) -> int:
    """Bytes of the (8, 128)-padded VMEM image of an array."""
    if len(shape) == 0:
        return jnp.dtype(dtype).itemsize
    if len(shape) == 1:
        lead, sub, lane = 1, 1, shape[0]
    else:
        lead = math.prod(shape[:-2])
        sub, lane = shape[-2], shape[-1]
    return lead * _round_up(sub, 8) * _round_up(lane, 128) * jnp.dtype(dtype).itemsize


# ---------------------------------------------------------------------------
# Kernels (all grid-less, whole arrays resident in VMEM)
# ---------------------------------------------------------------------------
def _kernel_interleave(x_ref, o_ref, *, d0, d1):
    # Lane-dense build: o_ref[i, j*d0 + k] = x_ref[k, j, i].
    # Per-k 2-D transpose (XLU path) + strided lane store; d0 is tiny, so the
    # Python loop is a static unroll.  Avoids any minor-dim-merge reshape.
    for k in range(d0):
        t_k = jnp.transpose(x_ref[k, :, :], (1, 0))        # (d2, d1)
        o_ref[:, pl.ds(k, d1, stride=d0)] = t_k


def _kernel_flat(x_ref, o_ref, *, total):
    # Lane-dense flat row: o_ref[0, i*d1*d0 + j*d0 + k] = x_ref[k, j, i].
    # Output width is padded to a multiple of 128; tail lanes stay unwritten
    # and are sliced off in the (jitted) wrapper.
    y = jnp.transpose(x_ref[...], (2, 1, 0))
    o_ref[:, :total] = y.reshape(1, total)


def _kernel_3d(x_ref, o_ref):
    # Direct 3-D permuted store (lane-sparse, known-good fallback).
    o_ref[...] = jnp.transpose(x_ref[...], (2, 1, 0))


# ---------------------------------------------------------------------------
# Jitted wrappers (pallas_call + free reshape dispatched as one executable)
# ---------------------------------------------------------------------------
def _build_interleave(shape, dtype):
    d0, d1, d2 = shape
    call = pl.pallas_call(
        functools.partial(_kernel_interleave, d0=d0, d1=d1),
        out_shape=jax.ShapeDtypeStruct((d2, d1 * d0), dtype),
        in_specs=[_VMEM_SPEC],
        out_specs=_VMEM_SPEC,
    )

    @jax.jit
    def fwd(x1):
        # Minor-dim split of a row-major array: metadata-only, free.
        return call(x1).reshape(d2, d1, d0)

    return fwd


def _build_flat(shape, dtype):
    d0, d1, d2 = shape
    total = d0 * d1 * d2
    padded = _round_up(total, 128)
    call = pl.pallas_call(
        functools.partial(_kernel_flat, total=total),
        out_shape=jax.ShapeDtypeStruct((1, padded), dtype),
        in_specs=[_VMEM_SPEC],
        out_specs=_VMEM_SPEC,
    )

    @jax.jit
    def fwd(x1):
        return call(x1)[0, :total].reshape(d2, d1, d0)

    return fwd


def _build_3d(shape, dtype):
    d0, d1, d2 = shape
    call = pl.pallas_call(
        _kernel_3d,
        out_shape=jax.ShapeDtypeStruct((d2, d1, d0), dtype),
        in_specs=[_VMEM_SPEC],
        out_specs=_VMEM_SPEC,
    )
    return jax.jit(call)


# ---------------------------------------------------------------------------
# Compile-only variant selection (no device execution, no host sync)
# ---------------------------------------------------------------------------
@functools.lru_cache(maxsize=None)
def _pick_impl(shape, dtype_name, device_kind):
    del device_kind  # cache-key only: Mosaic lowering support differs per chip
    dtype = jnp.dtype(dtype_name)
    d0, d1, d2 = shape

    footprint = (_padded_vmem_bytes(shape, dtype)
                 + _padded_vmem_bytes((d2, d1 * d0), dtype)
                 + _padded_vmem_bytes((d2, d1, d0), dtype))
    if footprint > _VMEM_BUDGET_BYTES:
        # TODO(synk): add a tiled-grid variant for inputs too large for the
        # grid-less whole-array-in-VMEM design (first binds on v7x 64 MiB VMEM).
        raise NotImplementedError(
            f"permute(2,1,0) kernel: padded VMEM footprint {footprint} B exceeds "
            f"budget {_VMEM_BUDGET_BYTES} B for input shape {shape}")

    aval = jax.ShapeDtypeStruct(shape, dtype)
    fallback = None
    for build in (_build_interleave, _build_flat, _build_3d):
        fn = build(shape, dtype)
        fallback = fn
        try:
            # Compile-only probe on abstract inputs: catches Mosaic lowering
            # rejections without running anything on the device.  A permute/
            # reshape variant that lowers is correct by construction.
            fn.lower(aval).compile()
            return fn
        except Exception:
            continue
    return fallback  # let the real call surface the error if nothing lowered


def model_forward(x1: jax.Array) -> jax.Array:
    """Equivalent of Model.forward: the nine-swap chain == x1.permute(2, 1, 0)."""
    assert x1.ndim == 3, x1.shape
    device_kind = jax.devices()[0].device_kind
    impl = _pick_impl(tuple(x1.shape), jnp.dtype(x1.dtype).name, device_kind)
    return impl(x1)


def model_forward_ref(x1: jax.Array) -> jax.Array:
    # Pure-JAX reference reproducing the nine-transpose chain literally.
    v1 = jnp.swapaxes(x1, 1, 0)
    v2 = jnp.swapaxes(v1, 1, 0)
    v3 = jnp.swapaxes(v2, 1, 0)
    v4 = jnp.swapaxes(v3, 1, 0)
    v5 = jnp.swapaxes(v4, 0, 2)
    v6 = jnp.swapaxes(v5, 0, 2)
    v7 = jnp.swapaxes(v6, 0, 2)
    v8 = jnp.swapaxes(v7, 1, 0)
    v9 = jnp.swapaxes(v8, 1, 0)
    return v9


if __name__ == "__main__":
    key = jax.random.PRNGKey(0)
    # Same shape the PyTorch script uses: torch.randn(4, 31, 28)
    x1 = jax.random.normal(key, (4, 31, 28), dtype=jnp.float32)

    out = jax.block_until_ready(model_forward(x1))
    ref = model_forward_ref(x1)

    assert out.shape == (28, 31, 4), out.shape
    assert out.dtype == x1.dtype
    assert jnp.array_equal(out, ref), "Pallas output mismatch vs reference"

    print("KERNEL_OK")
</pallas_src>

<mosaic_0001>
module attributes {stable_mosaic.version = 11 : i64} {
  func.func @_kernel_3d(%arg0: memref<4x31x28xf32, #tpu.memory_space<vmem>>, %arg1: memref<28x31x4xf32, #tpu.memory_space<vmem>>) attributes {dimension_semantics = [], scalar_prefetch = 0 : i64, scratch_operands = 0 : i64, tpu.core_type = #tpu.core_type<tc>} {
    %c0 = arith.constant 0 : index
    %c0_0 = arith.constant 0 : index
    %c0_1 = arith.constant 0 : index
    %0 = vector.load %arg0[%c0, %c0_0, %c0_1] : memref<4x31x28xf32, #tpu.memory_space<vmem>>, vector<4x31x28xf32>
    %1 = tpu.transpose %0, [2, 1, 0] : vector<4x31x28xf32> -> vector<28x31x4xf32>
    %c0_2 = arith.constant 0 : index
    %c0_3 = arith.constant 0 : index
    %c0_4 = arith.constant 0 : index
    %2 = vector.load %arg1[%c0_2, %c0_3, %c0_4] : memref<28x31x4xf32, #tpu.memory_space<vmem>>, vector<28x31x4xf32>
    tpu.vector_store %arg1[%c0_2, %c0_3, %c0_4], %1 {strides = array<i32>} : memref<28x31x4xf32, #tpu.memory_space<vmem>>, vector<28x31x4xf32>,
    return
  }
}

</mosaic_0001>

<bundles_post_ra>
// kernel: tpu_custom_call.1
= control target key start
LH: loop header
LB: loop body
LE: loop exit
PB: predicated region body
PF: predicated region fallthrough
CT: control target
= control target key end

     0   :  { %v1407_v20 = vmov 1983009808   ;;  %v157_v22 = vlaneseq  ;;  %v1408_v29 = vmov 1934713408   ;;  %v1409_v58 = vmov 0.0   ;;  %s1986_s0 = inlined_call_operand.vmem [shape: f32[4,31,28], index: 0, kind: input, shape index: {}]   ;;  %s1987_s1 = inlined_call_operand.vmem [shape: f32[28,31,4], index: 1, kind: output, shape index: {}]  }
   0x1   :  { %v12_v0 = vld [vmem:[%s1986_s0 + $0x20] sm:$0xff]  ;;  %v13_v2 = vld [vmem:[%s1986_s0 + $0x28] sm:$0xff]  ;;  %v14_v4 = vld [vmem:[%s1986_s0 + $0x30] sm:$0xff]  ;;  %v155_v21 = vunpack.c.l.s4 %v1407_v20  ;;  %v187_v30 = vunpack.c.l.s4 %v1408_v29  ;;  %vm1286_vm0 = vcmask 31744   ;;  %vm1290_vm1 = vcmask 30720  }
   0x2   :  { %v8_v1 = vld [vmem:[%s1986_s0] sm:$0xff]  ;;  %56 = vxpose.xlu1.b32.start [1/4] (short) (narrow) %v12_v0, 32  ;;  %v9_v3 = vld [vmem:[%s1986_s0 + $0x8] sm:$0xff]  ;;  %v10_v5 = vld [vmem:[%s1986_s0 + $0x10] sm:$0xff]  ;;  %v158_v26 = vshrl.u32 %v157_v22, 7 }
   0x3   :  { %24 = vxpose.xlu0.b32.start [1/4] (short) (narrow) %v8_v1, 32  ;;  %v15_v6 = vld [vmem:[%s1986_s0 + $0x38] sm:$0x7f]  ;;  %v20_v8 = vld [vmem:[%s1986_s0 + $0x60] sm:$0xff]  ;;  %v21_v10 = vld [vmem:[%s1986_s0 + $0x68] sm:$0xff]  ;;  %v156_v25 = vunpack.c.0.s8 %v155_v21  ;;  %v188_v34 = vunpack.c.0.s8 %v187_v30 }
   0x4   :  { %v11_v7 = vld [vmem:[%s1986_s0 + $0x18] sm:$0x7f]  ;;  %v16_v9 = vld [vmem:[%s1986_s0 + $0x40] sm:$0xff]  ;;  %v17_v11 = vld [vmem:[%s1986_s0 + $0x48] sm:$0xff] }
   0x5   :  { %v22_v12 = vld [vmem:[%s1986_s0 + $0x70] sm:$0xff]  ;;  %v23_v14 = vld [vmem:[%s1986_s0 + $0x78] sm:$0x7f]  ;;  %v1472_v31 = vsub.s32 %v156_v25, %v158_v26  ;;  %v1484_v41 = vsub.s32 %v188_v34, %v158_v26 }
   0x6   :  { %57 = vxpose.xlu1.b32.cont [2/4] (short) (narrow) %v13_v2, 32  ;;  %v18_v13 = vld [vmem:[%s1986_s0 + $0x50] sm:$0xff]  ;;  %v19_v15 = vld [vmem:[%s1986_s0 + $0x58] sm:$0x7f] }
   0x7   :  { %25 = vxpose.xlu0.b32.cont [2/4] (short) (narrow) %v9_v3, 32 }
   0xa   :  { %58 = vxpose.xlu1.b32.cont [3/4] (short) (narrow) %v14_v4, 32 }
   0xb   :  { %26 = vxpose.xlu0.b32.cont [3/4] (short) (narrow) %v10_v5, 32 }
   0xe   :  { %59 = vxpose.xlu1.b32.end [4/4] (short) (narrow) %v15_v6, 32 }
   0xf   :  { %27 = vxpose.xlu0.b32.end [4/4] (short) (narrow) %v11_v7, 32 }
  0x12   :  { %120 = vxpose.xlu1.b32.start [1/4] (short) (narrow) %v20_v8, 32 }
  0x13   :  { %88 = vxpose.xlu0.b32.start [1/4] (short) (narrow) %v16_v9, 32 }
  0x16   :  { %121 = vxpose.xlu1.b32.cont [2/4] (short) (narrow) %v21_v10, 32 }
  0x17   :  { %89 = vxpose.xlu0.b32.cont [2/4] (short) (narrow) %v17_v11, 32 }
  0x1a   :  { %122 = vxpose.xlu1.b32.cont [3/4] (short) (narrow) %v22_v12, 32 }
  0x1b   :  { %90 = vxpose.xlu0.b32.cont [3/4] (short) (narrow) %v18_v13, 32 }
  0x1e   :  { %123 = vxpose.xlu1.b32.end [4/4] (short) (narrow) %v23_v14, 32 }
  0x1f   :  { %91 = vxpose.xlu0.b32.end [4/4] (short) (narrow) %v19_v15, 32 }
  0x7e   :  { %v1468_v16 = vpop.trf.xlu1 }
  0x7f   :  { %v1470_v17 = vpop.trf.xlu0 }
  0x82   :  { %v73_v18 = vpop.trf.xlu1 }
  0x83   :  { %v41_v19 = vpop.trf.xlu0 }
  0x86   :  { %v74_v23 = vpop.trf.xlu1 }
  0x87   :  { %v42_v24 = vpop.trf.xlu0 }
  0x8a   :  { %v75_v27 = vpop.trf.xlu1 }
  0x8b   :  { %v43_v28 = vpop.trf.xlu0 }
  0x8e   :  { %v1474_v32 = vpop.trf.xlu1 }
  0x8f   :  { %v1476_v33 = vpop.trf.xlu0  ;;  %v168_v35 = vcombine.low %v1468_v16, %v1474_v32 }
  0x90   :  { %v152_v36 = vcombine.low %v1470_v17, %v1476_v33 }
  0x91   :  { %v176_v37 = vrot.slane %v168_v35, %v1472_v31 }
  0x92   :  { %v160_v38 = vrot.slane %v152_v36, %v1472_v31  ;;  %v137_v39 = vpop.trf.xlu1  ;;  %v169_v36 = vcombine.high %v1468_v16, %v1474_v32 }
  0x93   :  { %v105_v40 = vpop.trf.xlu0  ;;  %v236_v42 = vcombine.low %v73_v18, %v137_v39  ;;  %v237_v43 = vcombine.high %v73_v18, %v137_v39 }
  0x94   :  { %v220_v44 = vcombine.low %v41_v19, %v105_v40  ;;  %v221_v45 = vcombine.high %v41_v19, %v105_v40  ;;  %v184_v46 = vcombine.low %v160_v38, %v176_v37  ;;  %v185_v15 = vcombine.high %v160_v38, %v176_v37 }
  0x95   :  { %v1487_v47 = vrot.slane %v236_v42, %v1472_v31  ;;  %v251_v48 = vrot.slane %v237_v43, %v1472_v31  ;;  %v153_v37 = vcombine.high %v1470_v17, %v1476_v33 }
  0x96   :  { %v1491_v49 = vrot.slane %v220_v44, %v1472_v31  ;;  %v235_v50 = vrot.slane %v221_v45, %v1472_v31  ;;  %v138_v51 = vpop.trf.xlu1  ;;  %v192_v53 = vrot.slane %v184_v46, %v1484_v41  ;;  %v199_v29 = vrot.slane %v185_v15, %v1484_v41 }
  0x97   :  { %v106_v52 = vpop.trf.xlu0  ;;  %v304_v54 = vcombine.low %v74_v23, %v138_v51  ;;  %v305_v55 = vcombine.high %v74_v23, %v138_v51  ;;  %v183_v45 = vrot.slane %v169_v36, %v1472_v31  ;;  %v167_v46 = vrot.slane %v153_v37, %v1472_v31 }
  0x98   :  { %v288_v56 = vcombine.low %v42_v24, %v106_v52  ;;  %v289_v57 = vcombine.high %v42_v24, %v106_v52  ;;  %390 = vxpose.xlu0.b32.start.end [1/1] (short) (narrow) %v192_v53, 32  ;;  %v216_v59 = vcombine.high %v192_v53, %v1409_v58  ;;  %v252_v61 = vcombine.low %v1491_v49, %v1487_v47 }
  0x99   :  { %v319_v60 = vrot.slane %v305_v55, %v1472_v31  ;;  %v253_v62 = vcombine.high %v1491_v49, %v1487_v47  ;;  %v268_v1 = vcombine.low %v235_v50, %v251_v48  ;;  %v269_v2 = vcombine.high %v235_v50, %v251_v48 }
  0x9a   :  { %422 = vxpose.xlu1.b32.start.end [1/1] (short) (narrow) %v216_v59, 32  ;;  %v139_v63 = vpop.trf.xlu1  ;;  %v296_v3 = vrot.slane %v288_v56, %v1472_v31  ;;  %v312_v4 = vrot.slane %v304_v54, %v1472_v31  ;;  %v303_v5 = vrot.slane %v289_v57, %v1472_v31  ;;  %v217_v44 = vcombine.high %v199_v29, %v1409_v58 }
  0x9b   :  { %v107_v0 = vpop.trf.xlu0  ;;  %v364_v6 = vcombine.low %v75_v27, %v139_v63  ;;  %v267_v8 = vrot.slane %v253_v62, %v1484_v41  ;;  %v276_v9 = vrot.slane %v268_v1, %v1484_v41  ;;  %v283_v10 = vrot.slane %v269_v2, %v1484_v41 }
  0x9c   :  { %v356_v7 = vcombine.low %v43_v28, %v107_v0  ;;  %v320_v11 = vcombine.low %v296_v3, %v312_v4  ;;  %v321_v12 = vcombine.high %v296_v3, %v312_v4  ;;  %v336_v25 = vcombine.low %v303_v5, %v319_v60 }
  0x9d   :  { %v371_v13 = vrot.slane %v364_v6, %v1472_v31  ;;  %v285_v18 = vcombine.high %v267_v8, %v1409_v58  ;;  %v286_v19 = vcombine.high %v276_v9, %v1409_v58  ;;  %v287_v20 = vcombine.high %v283_v10, %v1409_v58 }
  0x9e   :  { %v363_v14 = vrot.slane %v356_v7, %v1472_v31  ;;  %v328_v21 = vrot.slane %v320_v11, %v1484_v41  ;;  %v335_v22 = vrot.slane %v321_v12, %v1484_v41  ;;  %v337_v28 = vcombine.high %v303_v5, %v319_v60 }
  0x9f   :  { %v344_v30 = vrot.slane %v336_v25, %v1484_v41  ;;  %v200_v16 = vcombine.low %v167_v46, %v183_v45  ;;  %v201_v33 = vcombine.high %v167_v46, %v183_v45  ;;  %v260_v49 = vrot.slane %v252_v61, %v1484_v41 }
  0xa0   :  { %v372_v23 = vcombine.low %v363_v14, %v371_v13  ;;  %v373_v24 = vcombine.high %v363_v14, %v371_v13  ;;  %v352_v26 = vcombine.high %v328_v21, %v1409_v58  ;;  %v353_v27 = vcombine.high %v335_v22, %v1409_v58 }
  0xa1   :  { %v351_v38 = vrot.slane %v337_v28, %v1484_v41  ;;  %v354_v39 = vcombine.high %v344_v30, %v1409_v58  ;;  %v208_v17 = vrot.slane %v200_v16, %v1484_v41  ;;  %v215_v47 = vrot.slane %v201_v33, %v1484_v41 }
  0xa2   :  { %v1513_v34 = vrot.slane %v372_v23, %v1484_v41  ;;  %v1516_v35 = vrot.slane %v373_v24, %v1484_v41  ;;  %v284_v50 = vcombine.high %v260_v49, %v1409_v58 }
  0xa3   :  { %v355_v43 = vcombine.high %v351_v38, %v1409_v58  ;;  %v218_v32 = vcombine.high %v208_v17, %v1409_v58  ;;  %v219_v48 = vcombine.high %v215_v47, %v1409_v58 }
  0xa4   :  { %v1524_v40 = vcombine.high %v1513_v34, %v1409_v58  ;;  %v1527_v42 = vcombine.high %v1516_v35, %v1409_v58 }
  0xa5   :  { %454 = vxpose.xlu0.b32.start.end [1/1] (short) (narrow) %v199_v29, 32 }
  0xa7   :  { %486 = vxpose.xlu1.b32.start.end [1/1] (short) (narrow) %v217_v44, 32 }
  0xb2   :  { %518 = vxpose.xlu0.b32.start.end [1/1] (short) (narrow) %v208_v17, 32 }
  0xb4   :  { %550 = vxpose.xlu1.b32.start.end [1/1] (short) (narrow) %v218_v32, 32 }
  0xbf   :  { %582 = vxpose.xlu0.b32.start.end [1/1] (short) (narrow) %v215_v47, 32 }
  0xc1   :  { %614 = vxpose.xlu1.b32.start.end [1/1] (short) (narrow) %v219_v48, 32 }
  0xcc   :  { %646 = vxpose.xlu0.b32.start.end [1/1] (short) (narrow) %v260_v49, 32 }
  0xce   :  { %678 = vxpose.xlu1.b32.start.end [1/1] (short) (narrow) %v284_v50, 32 }
  0xd9   :  { %710 = vxpose.xlu0.b32.start.end [1/1] (short) (narrow) %v267_v8, 32 }
  0xdb   :  { %742 = vxpose.xlu1.b32.start.end [1/1] (short) (narrow) %v285_v18, 32 }
  0xe6   :  { %774 = vxpose.xlu0.b32.start.end [1/1] (short) (narrow) %v276_v9, 32 }
  0xe8   :  { %806 = vxpose.xlu1.b32.start.end [1/1] (short) (narrow) %v286_v19, 32 }
  0xf3   :  { %838 = vxpose.xlu0.b32.start.end [1/1] (short) (narrow) %v283_v10, 32 }
  0xf5   :  { %870 = vxpose.xlu1.b32.start.end [1/1] (short) (narrow) %v287_v20, 32 }
 0x100   :  { %902 = vxpose.xlu0.b32.start.end [1/1] (short) (narrow) %v328_v21, 32 }
 0x102   :  { %934 = vxpose.xlu1.b32.start.end [1/1] (short) (narrow) %v352_v26, 32 }
 0x10d   :  { %966 = vxpose.xlu0.b32.start.end [1/1] (short) (narrow) %v335_v22, 32 }
 0x10f   :  { %998 = vxpose.xlu1.b32.start.end [1/1] (short) (narrow) %v353_v27, 32 }
 0x114   :  { %v406_v31 = vpop.trf.xlu0 }
 0x115   :  { %1287 = vst.msk [vmem:[%s1987_s1] sm:$0xff] %vm1286_vm0, %v406_v31 }
 0x116   :  { %v438_v41 = vpop.trf.xlu1 }
 0x117   :  { %1292 = vst.msk [vmem:[%s1987_s1 + $0x20] sm:$0xff] %vm1286_vm0, %v438_v41 }
 0x118   :  { %v407_v51 = vpop.trf.xlu0 }
 0x119   :  { %1288 = vst.msk [vmem:[%s1987_s1 + $0x8] sm:$0xff] %vm1286_vm0, %v407_v51 }
 0x11a   :  { %v439_v52 = vpop.trf.xlu1  ;;  %1030 = vxpose.xlu0.b32.start.end [1/1] (short) (narrow) %v344_v30, 32 }
 0x11b   :  { %1293 = vst.msk [vmem:[%s1987_s1 + $0x28] sm:$0xff] %vm1286_vm0, %v439_v52 }
 0x11c   :  { %1062 = vxpose.xlu1.b32.start.end [1/1] (short) (narrow) %v354_v39, 32  ;;  %v408_v53 = vpop.trf.xlu0 }
 0x11d   :  { %1289 = vst.msk [vmem:[%s1987_s1 + $0x10] sm:$0xff] %vm1286_vm0, %v408_v53 }
 0x11e   :  { %v440_v54 = vpop.trf.xlu1 }
 0x11f   :  { %1294 = vst.msk [vmem:[%s1987_s1 + $0x30] sm:$0xff] %vm1286_vm0, %v440_v54 }
 0x120   :  { %v409_v55 = vpop.trf.xlu0 }
 0x121   :  { %1291 = vst.msk [vmem:[%s1987_s1 + $0x18] sm:$0x7f] %vm1290_vm1, %v409_v55 }
 0x122   :  { %v441_v56 = vpop.trf.xlu1 }
 0x123   :  { %1295 = vst.msk [vmem:[%s1987_s1 + $0x38] sm:$0x7f] %vm1290_vm1, %v441_v56 }
 0x124   :  { %v470_v57 = vpop.trf.xlu0 }
 0x125   :  { %1296 = vst.msk [vmem:[%s1987_s1 + $0x40] sm:$0xff] %vm1286_vm0, %v470_v57 }
 0x126   :  { %v502_v58 = vpop.trf.xlu1 }
 0x127   :  { %1300 = vst.msk [vmem:[%s1987_s1 + $0x60] sm:$0xff] %vm1286_vm0, %v502_v58  ;;  %1094 = vxpose.xlu0.b32.start.end [1/1] (short) (narrow) %v351_v38, 32 }
 0x128   :  { %v471_v59 = vpop.trf.xlu0 }
 0x129   :  { %1126 = vxpose.xlu1.b32.start.end [1/1] (short) (narrow) %v355_v43, 32  ;;  %1297 = vst.msk [vmem:[%s1987_s1 + $0x48] sm:$0xff] %vm1286_vm0, %v471_v59 }
 0x12a   :  { %v503_v60 = vpop.trf.xlu1 }
 0x12b   :  { %1301 = vst.msk [vmem:[%s1987_s1 + $0x68] sm:$0xff] %vm1286_vm0, %v503_v60 }
 0x12c   :  { %v472_v61 = vpop.trf.xlu0 }
 0x12d   :  { %1298 = vst.msk [vmem:[%s1987_s1 + $0x50] sm:$0xff] %vm1286_vm0, %v472_v61 }
 0x12e   :  { %v504_v62 = vpop.trf.xlu1 }
 0x12f   :  { %1302 = vst.msk [vmem:[%s1987_s1 + $0x70] sm:$0xff] %vm1286_vm0, %v504_v62 }
 0x130   :  { %v473_v63 = vpop.trf.xlu0 }
 0x131   :  { %1299 = vst.msk [vmem:[%s1987_s1 + $0x58] sm:$0x7f] %vm1290_vm1, %v473_v63 }
 0x132   :  { %v505_v0 = vpop.trf.xlu1 }
 0x133   :  { %1303 = vst.msk [vmem:[%s1987_s1 + $0x78] sm:$0x7f] %vm1290_vm1, %v505_v0 }
 0x134   :  { %1158 = vxpose.xlu0.b32.start.end [1/1] (short) (narrow) %v1513_v34, 32  ;;  %v534_v1 = vpop.trf.xlu0 }
 0x135   :  { %1304 = vst.msk [vmem:[%s1987_s1 + $0x80] sm:$0xff] %vm1286_vm0, %v534_v1 }
 0x136   :  { %v566_v2 = vpop.trf.xlu1  ;;  %1190 = vxpose.xlu1.b32.start.end [1/1] (short) (narrow) %v1524_v40, 32 }
 0x137   :  { %1308 = vst.msk [vmem:[%s1987_s1 + $0xa0] sm:$0xff] %vm1286_vm0, %v566_v2 }
 0x138   :  { %v535_v3 = vpop.trf.xlu0 }
 0x139   :  { %1305 = vst.msk [vmem:[%s1987_s1 + $0x88] sm:$0xff] %vm1286_vm0, %v535_v3 }
 0x13a   :  { %v567_v4 = vpop.trf.xlu1 }
 0x13b   :  { %1309 = vst.msk [vmem:[%s1987_s1 + $0xa8] sm:$0xff] %vm1286_vm0, %v567_v4 }
 0x13c   :  { %v536_v5 = vpop.trf.xlu0 }
 0x13d   :  { %1306 = vst.msk [vmem:[%s1987_s1 + $0x90] sm:$0xff] %vm1286_vm0, %v536_v5 }
 0x13e   :  { %v568_v6 = vpop.trf.xlu1 }
 0x13f   :  { %1310 = vst.msk [vmem:[%s1987_s1 + $0xb0] sm:$0xff] %vm1286_vm0, %v568_v6 }
 0x140   :  { %v537_v7 = vpop.trf.xlu0 }
 0x141   :  { %1222 = vxpose.xlu0.b32.start.end [1/1] (short) (narrow) %v1516_v35, 32  ;;  %1307 = vst.msk [vmem:[%s1987_s1 + $0x98] sm:$0x7f] %vm1290_vm1, %v537_v7 }
 0x142   :  { %v569_v8 = vpop.trf.xlu1 }
 0x143   :  { %1311 = vst.msk [vmem:[%s1987_s1 + $0xb8] sm:$0x7f] %vm1290_vm1, %v569_v8  ;;  %1254 = vxpose.xlu1.b32.start.end [1/1] (short) (narrow) %v1527_v42, 32 }
 0x144   :  { %v598_v9 = vpop.trf.xlu0 }
 0x145   :  { %1312 = vst.msk [vmem:[%s1987_s1 + $0xc0] sm:$0xff] %vm1286_vm0, %v598_v9 }
 0x146   :  { %v630_v10 = vpop.trf.xlu1 }
 0x147   :  { %1316 = vst.msk [vmem:[%s1987_s1 + $0xe0] sm:$0xff] %vm1286_vm0, %v630_v10 }
 0x148   :  { %v599_v11 = vpop.trf.xlu0 }
 0x149   :  { %1313 = vst.msk [vmem:[%s1987_s1 + $0xc8] sm:$0xff] %vm1286_vm0, %v599_v11 }
 0x14a   :  { %v631_v12 = vpop.trf.xlu1 }
 0x14b   :  { %1317 = vst.msk [vmem:[%s1987_s1 + $0xe8] sm:$0xff] %vm1286_vm0, %v631_v12 }
 0x14c   :  { %v600_v13 = vpop.trf.xlu0 }
 0x14d   :  { %1314 = vst.msk [vmem:[%s1987_s1 + $0xd0] sm:$0xff] %vm1286_vm0, %v600_v13 }
 0x14e   :  { %v632_v14 = vpop.trf.xlu1 }
 0x14f   :  { %1318 = vst.msk [vmem:[%s1987_s1 + $0xf0] sm:$0xff] %vm1286_vm0, %v632_v14 }
 0x150   :  { %v601_v15 = vpop.trf.xlu0 }
 0x151   :  { %1315 = vst.msk [vmem:[%s1987_s1 + $0xd8] sm:$0x7f] %vm1290_vm1, %v601_v15 }
 0x152   :  { %v633_v18 = vpop.trf.xlu1 }
 0x153   :  { %1319 = vst.msk [vmem:[%s1987_s1 + $0xf8] sm:$0x7f] %vm1290_vm1, %v633_v18 }
 0x154   :  { %v662_v19 = vpop.trf.xlu0 }
 0x155   :  { %1320 = vst.msk [vmem:[%s1987_s1 + $0x100] sm:$0xff] %vm1286_vm0, %v662_v19 }
 0x156   :  { %v694_v20 = vpop.trf.xlu1 }
 0x157   :  { %1324 = vst.msk [vmem:[%s1987_s1 + $0x120] sm:$0xff] %vm1286_vm0, %v694_v20 }
 0x158   :  { %v663_v21 = vpop.trf.xlu0 }
 0x159   :  { %1321 = vst.msk [vmem:[%s1987_s1 + $0x108] sm:$0xff] %vm1286_vm0, %v663_v21 }
 0x15a   :  { %v695_v22 = vpop.trf.xlu1 }
 0x15b   :  { %1325 = vst.msk [vmem:[%s1987_s1 + $0x128] sm:$0xff] %vm1286_vm0, %v695_v22 }
 0x15c   :  { %v664_v23 = vpop.trf.xlu0 }
 0x15d   :  { %1322 = vst.msk [vmem:[%s1987_s1 + $0x110] sm:$0xff] %vm1286_vm0, %v664_v23 }
 0x15e   :  { %v696_v24 = vpop.trf.xlu1 }
 0x15f   :  { %1326 = vst.msk [vmem:[%s1987_s1 + $0x130] sm:$0xff] %vm1286_vm0, %v696_v24 }
 0x160   :  { %v665_v25 = vpop.trf.xlu0 }
 0x161   :  { %1323 = vst.msk [vmem:[%s1987_s1 + $0x118] sm:$0x7f] %vm1290_vm1, %v665_v25 }
 0x162   :  { %v697_v26 = vpop.trf.xlu1 }
 0x163   :  { %1327 = vst.msk [vmem:[%s1987_s1 + $0x138] sm:$0x7f] %vm1290_vm1, %v697_v26 }
 0x164   :  { %v726_v27 = vpop.trf.xlu0 }
 0x165   :  { %1328 = vst.msk [vmem:[%s1987_s1 + $0x140] sm:$0xff] %vm1286_vm0, %v726_v27 }
 0x166   :  { %v758_v28 = vpop.trf.xlu1 }
 0x167   :  { %1332 = vst.msk [vmem:[%s1987_s1 + $0x160] sm:$0xff] %vm1286_vm0, %v758_v28 }
 0x168   :  { %v727_v29 = vpop.trf.xlu0 }
 0x169   :  { %1329 = vst.msk [vmem:[%s1987_s1 + $0x148] sm:$0xff] %vm1286_vm0, %v727_v29 }
 0x16a   :  { %v759_v30 = vpop.trf.xlu1 }
 0x16b   :  { %1333 = vst.msk [vmem:[%s1987_s1 + $0x168] sm:$0xff] %vm1286_vm0, %v759_v30 }
 0x16c   :  { %v728_v34 = vpop.trf.xlu0 }
 0x16d   :  { %1330 = vst.msk [vmem:[%s1987_s1 + $0x150] sm:$0xff] %vm1286_vm0, %v728_v34 }
 0x16e   :  { %v760_v35 = vpop.trf.xlu1 }
 0x16f   :  { %1334 = vst.msk [vmem:[%s1987_s1 + $0x170] sm:$0xff] %vm1286_vm0, %v760_v35 }
 0x170   :  { %v729_v36 = vpop.trf.xlu0 }
 0x171   :  { %1331 = vst.msk [vmem:[%s1987_s1 + $0x158] sm:$0x7f] %vm1290_vm1, %v729_v36 }
 0x172   :  { %v761_v37 = vpop.trf.xlu1 }
 0x173   :  { %1335 = vst.msk [vmem:[%s1987_s1 + $0x178] sm:$0x7f] %vm1290_vm1, %v761_v37 }
 0x174   :  { %v790_v38 = vpop.trf.xlu0 }
 0x175   :  { %1336 = vst.msk [vmem:[%s1987_s1 + $0x180] sm:$0xff] %vm1286_vm0, %v790_v38 }
 0x176   :  { %v822_v39 = vpop.trf.xlu1 }
 0x177   :  { %1340 = vst.msk [vmem:[%s1987_s1 + $0x1a0] sm:$0xff] %vm1286_vm0, %v822_v39 }
 0x178   :  { %v791_v40 = vpop.trf.xlu0 }
 0x179   :  { %1337 = vst.msk [vmem:[%s1987_s1 + $0x188] sm:$0xff] %vm1286_vm0, %v791_v40 }
 0x17a   :  { %v823_v42 = vpop.trf.xlu1 }
 0x17b   :  { %1341 = vst.msk [vmem:[%s1987_s1 + $0x1a8] sm:$0xff] %vm1286_vm0, %v823_v42 }
 0x17c   :  { %v792_v43 = vpop.trf.xlu0 }
 0x17d   :  { %1338 = vst.msk [vmem:[%s1987_s1 + $0x190] sm:$0xff] %vm1286_vm0, %v792_v43 }
 0x17e   :  { %v824_v44 = vpop.trf.xlu1 }
 0x17f   :  { %1342 = vst.msk [vmem:[%s1987_s1 + $0x1b0] sm:$0xff] %vm1286_vm0, %v824_v44 }
 0x180   :  { %v793_v45 = vpop.trf.xlu0 }
 0x181   :  { %1339 = vst.msk [vmem:[%s1987_s1 + $0x198] sm:$0x7f] %vm1290_vm1, %v793_v45 }
 0x182   :  { %v825_v46 = vpop.trf.xlu1 }
 0x183   :  { %1343 = vst.msk [vmem:[%s1987_s1 + $0x1b8] sm:$0x7f] %vm1290_vm1, %v825_v46 }
 0x184   :  { %v854_v16 = vpop.trf.xlu0 }
 0x185   :  { %1344 = vst.msk [vmem:[%s1987_s1 + $0x1c0] sm:$0xff] %vm1286_vm0, %v854_v16 }
 0x186   :  { %v886_v17 = vpop.trf.xlu1 }
 0x187   :  { %1348 = vst.msk [vmem:[%s1987_s1 + $0x1e0] sm:$0xff] %vm1286_vm0, %v886_v17 }
 0x188   :  { %v855_v32 = vpop.trf.xlu0 }
 0x189   :  { %1345 = vst.msk [vmem:[%s1987_s1 + $0x1c8] sm:$0xff] %vm1286_vm0, %v855_v32 }
 0x18a   :  { %v887_v33 = vpop.trf.xlu1 }
 0x18b   :  { %1349 = vst.msk [vmem:[%s1987_s1 + $0x1e8] sm:$0xff] %vm1286_vm0, %v887_v33 }
 0x18c   :  { %v856_v47 = vpop.trf.xlu0 }
 0x18d   :  { %1346 = vst.msk [vmem:[%s1987_s1 + $0x1d0] sm:$0xff] %vm1286_vm0, %v856_v47 }
 0x18e   :  { %v888_v48 = vpop.trf.xlu1 }
 0x18f   :  { %1350 = vst.msk [vmem:[%s1987_s1 + $0x1f0] sm:$0xff] %vm1286_vm0, %v888_v48 }
 0x190   :  { %v857_v49 = vpop.trf.xlu0 }
 0x191   :  { %1347 = vst.msk [vmem:[%s1987_s1 + $0x1d8] sm:$0x7f] %vm1290_vm1, %v857_v49 }
 0x192   :  { %v889_v50 = vpop.trf.xlu1 }
 0x193   :  { %1351 = vst.msk [vmem:[%s1987_s1 + $0x1f8] sm:$0x7f] %vm1290_vm1, %v889_v50 }
 0x194   :  { %v918_v31 = vpop.trf.xlu0 }
 0x195   :  { %1352 = vst.msk [vmem:[%s1987_s1 + $0x200] sm:$0xff] %vm1286_vm0, %v918_v31 }
 0x196   :  { %v950_v41 = vpop.trf.xlu1 }
 0x197   :  { %1356 = vst.msk [vmem:[%s1987_s1 + $0x220] sm:$0xff] %vm1286_vm0, %v950_v41 }
 0x198   :  { %v919_v51 = vpop.trf.xlu0 }
 0x199   :  { %1353 = vst.msk [vmem:[%s1987_s1 + $0x208] sm:$0xff] %vm1286_vm0, %v919_v51 }
 0x19a   :  { %v951_v52 = vpop.trf.xlu1 }
 0x19b   :  { %1357 = vst.msk [vmem:[%s1987_s1 + $0x228] sm:$0xff] %vm1286_vm0, %v951_v52 }
 0x19c   :  { %v920_v53 = vpop.trf.xlu0 }
 0x19d   :  { %1354 = vst.msk [vmem:[%s1987_s1 + $0x210] sm:$0xff] %vm1286_vm0, %v920_v53 }
 0x19e   :  { %v952_v54 = vpop.trf.xlu1 }
 0x19f   :  { %1358 = vst.msk [vmem:[%s1987_s1 + $0x230] sm:$0xff] %vm1286_vm0, %v952_v54 }
 0x1a0   :  { %v921_v55 = vpop.trf.xlu0 }
 0x1a1   :  { %1355 = vst.msk [vmem:[%s1987_s1 + $0x218] sm:$0x7f] %vm1290_vm1, %v921_v55 }
 0x1a2   :  { %v953_v56 = vpop.trf.xlu1 }
 0x1a3   :  { %1359 = vst.msk [vmem:[%s1987_s1 + $0x238] sm:$0x7f] %vm1290_vm1, %v953_v56 }
 0x1a4   :  { %v982_v57 = vpop.trf.xlu0 }
 0x1a5   :  { %1360 = vst.msk [vmem:[%s1987_s1 + $0x240] sm:$0xff] %vm1286_vm0, %v982_v57 }
 0x1a6   :  { %v1014_v58 = vpop.trf.xlu1 }
 0x1a7   :  { %1364 = vst.msk [vmem:[%s1987_s1 + $0x260] sm:$0xff] %vm1286_vm0, %v1014_v58 }
 0x1a8   :  { %v983_v59 = vpop.trf.xlu0 }
 0x1a9   :  { %1361 = vst.msk [vmem:[%s1987_s1 + $0x248] sm:$0xff] %vm1286_vm0, %v983_v59 }
 0x1aa   :  { %v1015_v60 = vpop.trf.xlu1 }
 0x1ab   :  { %1365 = vst.msk [vmem:[%s1987_s1 + $0x268] sm:$0xff] %vm1286_vm0, %v1015_v60 }
 0x1ac   :  { %v984_v61 = vpop.trf.xlu0 }
 0x1ad   :  { %1362 = vst.msk [vmem:[%s1987_s1 + $0x250] sm:$0xff] %vm1286_vm0, %v984_v61 }
 0x1ae   :  { %v1016_v62 = vpop.trf.xlu1 }
 0x1af   :  { %1366 = vst.msk [vmem:[%s1987_s1 + $0x270] sm:$0xff] %vm1286_vm0, %v1016_v62 }
 0x1b0   :  { %v985_v63 = vpop.trf.xlu0 }
 0x1b1   :  { %1363 = vst.msk [vmem:[%s1987_s1 + $0x258] sm:$0x7f] %vm1290_vm1, %v985_v63 }
 0x1b2   :  { %v1017_v0 = vpop.trf.xlu1 }
 0x1b3   :  { %1367 = vst.msk [vmem:[%s1987_s1 + $0x278] sm:$0x7f] %vm1290_vm1, %v1017_v0 }
 0x1b4   :  { %v1046_v1 = vpop.trf.xlu0 }
 0x1b5   :  { %1368 = vst.msk [vmem:[%s1987_s1 + $0x280] sm:$0xff] %vm1286_vm0, %v1046_v1 }
 0x1b6   :  { %v1078_v2 = vpop.trf.xlu1 }
 0x1b7   :  { %1372 = vst.msk [vmem:[%s1987_s1 + $0x2a0] sm:$0xff] %vm1286_vm0, %v1078_v2 }
 0x1b8   :  { %v1047_v3 = vpop.trf.xlu0 }
 0x1b9   :  { %1369 = vst.msk [vmem:[%s1987_s1 + $0x288] sm:$0xff] %vm1286_vm0, %v1047_v3 }
 0x1ba   :  { %v1079_v4 = vpop.trf.xlu1 }
 0x1bb   :  { %1373 = vst.msk [vmem:[%s1987_s1 + $0x2a8] sm:$0xff] %vm1286_vm0, %v1079_v4 }
 0x1bc   :  { %v1048_v5 = vpop.trf.xlu0 }
 0x1bd   :  { %1370 = vst.msk [vmem:[%s1987_s1 + $0x290] sm:$0xff] %vm1286_vm0, %v1048_v5 }
 0x1be   :  { %v1080_v6 = vpop.trf.xlu1 }
 0x1bf   :  { %1374 = vst.msk [vmem:[%s1987_s1 + $0x2b0] sm:$0xff] %vm1286_vm0, %v1080_v6 }
 0x1c0   :  { %v1049_v7 = vpop.trf.xlu0 }
 0x1c1   :  { %1371 = vst.msk [vmem:[%s1987_s1 + $0x298] sm:$0x7f] %vm1290_vm1, %v1049_v7 }
 0x1c2   :  { %v1081_v8 = vpop.trf.xlu1 }
 0x1c3   :  { %1375 = vst.msk [vmem:[%s1987_s1 + $0x2b8] sm:$0x7f] %vm1290_vm1, %v1081_v8 }
 0x1c4   :  { %v1110_v9 = vpop.trf.xlu0 }
 0x1c5   :  { %1376 = vst.msk [vmem:[%s1987_s1 + $0x2c0] sm:$0xff] %vm1286_vm0, %v1110_v9 }
 0x1c6   :  { %v1142_v10 = vpop.trf.xlu1 }
 0x1c7   :  { %1380 = vst.msk [vmem:[%s1987_s1 + $0x2e0] sm:$0xff] %vm1286_vm0, %v1142_v10 }
 0x1c8   :  { %v1111_v11 = vpop.trf.xlu0 }
 0x1c9   :  { %1377 = vst.msk [vmem:[%s1987_s1 + $0x2c8] sm:$0xff] %vm1286_vm0, %v1111_v11 }
 0x1ca   :  { %v1143_v12 = vpop.trf.xlu1 }
 0x1cb   :  { %1381 = vst.msk [vmem:[%s1987_s1 + $0x2e8] sm:$0xff] %vm1286_vm0, %v1143_v12 }
 0x1cc   :  { %v1112_v13 = vpop.trf.xlu0 }
 0x1cd   :  { %1378 = vst.msk [vmem:[%s1987_s1 + $0x2d0] sm:$0xff] %vm1286_vm0, %v1112_v13 }
 0x1ce   :  { %v1144_v14 = vpop.trf.xlu1 }
 0x1cf   :  { %1382 = vst.msk [vmem:[%s1987_s1 + $0x2f0] sm:$0xff] %vm1286_vm0, %v1144_v14 }
 0x1d0   :  { %v1113_v15 = vpop.trf.xlu0 }
 0x1d1   :  { %1379 = vst.msk [vmem:[%s1987_s1 + $0x2d8] sm:$0x7f] %vm1290_vm1, %v1113_v15 }
 0x1d2   :  { %v1145_v18 = vpop.trf.xlu1 }
 0x1d3   :  { %1383 = vst.msk [vmem:[%s1987_s1 + $0x2f8] sm:$0x7f] %vm1290_vm1, %v1145_v18 }
 0x1d4   :  { %v1174_v19 = vpop.trf.xlu0 }
 0x1d5   :  { %1384 = vst.msk [vmem:[%s1987_s1 + $0x300] sm:$0xff] %vm1286_vm0, %v1174_v19 }
 0x1d6   :  { %v1206_v20 = vpop.trf.xlu1 }
 0x1d7   :  { %1388 = vst.msk [vmem:[%s1987_s1 + $0x320] sm:$0xff] %vm1286_vm0, %v1206_v20 }
 0x1d8   :  { %v1175_v21 = vpop.trf.xlu0 }
 0x1d9   :  { %1385 = vst.msk [vmem:[%s1987_s1 + $0x308] sm:$0xff] %vm1286_vm0, %v1175_v21 }
 0x1da   :  { %v1207_v22 = vpop.trf.xlu1 }
 0x1db   :  { %1389 = vst.msk [vmem:[%s1987_s1 + $0x328] sm:$0xff] %vm1286_vm0, %v1207_v22 }
 0x1dc   :  { %v1176_v23 = vpop.trf.xlu0 }
 0x1dd   :  { %1386 = vst.msk [vmem:[%s1987_s1 + $0x310] sm:$0xff] %vm1286_vm0, %v1176_v23 }
 0x1de   :  { %v1208_v24 = vpop.trf.xlu1 }
 0x1df   :  { %1390 = vst.msk [vmem:[%s1987_s1 + $0x330] sm:$0xff] %vm1286_vm0, %v1208_v24 }
 0x1e0   :  { %v1177_v25 = vpop.trf.xlu0 }
 0x1e1   :  { %1387 = vst.msk [vmem:[%s1987_s1 + $0x318] sm:$0x7f] %vm1290_vm1, %v1177_v25 }
 0x1e2   :  { %v1209_v26 = vpop.trf.xlu1 }
 0x1e3   :  { %1391 = vst.msk [vmem:[%s1987_s1 + $0x338] sm:$0x7f] %vm1290_vm1, %v1209_v26 }
 0x1e4   :  { %v1238_v27 = vpop.trf.xlu0 }
 0x1e5   :  { %1392 = vst.msk [vmem:[%s1987_s1 + $0x340] sm:$0xff] %vm1286_vm0, %v1238_v27 }
 0x1e6   :  { %v1270_v28 = vpop.trf.xlu1 }
 0x1e7   :  { %1396 = vst.msk [vmem:[%s1987_s1 + $0x360] sm:$0xff] %vm1286_vm0, %v1270_v28 }
 0x1e8   :  { %v1239_v29 = vpop.trf.xlu0 }
 0x1e9   :  { %1393 = vst.msk [vmem:[%s1987_s1 + $0x348] sm:$0xff] %vm1286_vm0, %v1239_v29 }
 0x1ea   :  { %v1271_v30 = vpop.trf.xlu1 }
 0x1eb   :  { %1397 = vst.msk [vmem:[%s1987_s1 + $0x368] sm:$0xff] %vm1286_vm0, %v1271_v30 }
 0x1ec   :  { %v1240_v34 = vpop.trf.xlu0 }
 0x1ed   :  { %1394 = vst.msk [vmem:[%s1987_s1 + $0x350] sm:$0xff] %vm1286_vm0, %v1240_v34 }
 0x1ee   :  { %v1272_v35 = vpop.trf.xlu1 }
 0x1ef   :  { %1398 = vst.msk [vmem:[%s1987_s1 + $0x370] sm:$0xff] %vm1286_vm0, %v1272_v35 }
 0x1f0   :  { %v1241_v36 = vpop.trf.xlu0 }
 0x1f1   :  { %1395 = vst.msk [vmem:[%s1987_s1 + $0x358] sm:$0x7f] %vm1290_vm1, %v1241_v36 }
 0x1f2   :  { %v1273_v37 = vpop.trf.xlu1 }
 0x1f3   :  { %1399 = vst.msk [vmem:[%s1987_s1 + $0x378] sm:$0x7f] %vm1290_vm1, %v1273_v37 }

</bundles_post_ra>
